<compile_context>
chip_gen: v7x
topology: tpu7x:2x2x1
jax: 0.10.0
libtpu: 0.0.40
codegen_flags: <defaults>
</compile_context>

<pallas_src>
import math
import numpy as np

import jax
import jax.numpy as jnp
from jax.experimental import pallas as pl
from jax.experimental.pallas import tpu as pltpu

# ---------------- config (MCTSConfig, small shapes) ----------------
HIDDEN = 32           # hidden_size / node_embedding_size
ACTION_SPACE = 16     # action_space_size
TOP_K = 4             # top_k_actions
NUM_SIMULATIONS = 6
MAX_TREE_DEPTH = 2
SAMPLING_STEPS = 3
EXPLORATION_C = 1.0
DISCOUNT = 0.9
VALUE_SCALE = 0.1
POLICY_TEMP = 1.0
TEMPERATURE = 1.0
LN_EPS = 1e-5


# ---------------- in-kernel helpers (traced) ----------------
def _ln(x, g, b):
    mu = jnp.mean(x, axis=-1, keepdims=True)
    var = jnp.mean((x - mu) ** 2, axis=-1, keepdims=True)
    return (x - mu) * jax.lax.rsqrt(var + LN_EPS) * g + b


def _gelu(x):
    # TODO(synk): PyTorch nn.GELU default is erf-exact; tanh approximation used here (Mosaic-safe).
    c = 0.7978845608028654  # sqrt(2/pi)
    return 0.5 * x * (1.0 + jnp.tanh(c * (x + 0.044715 * x * x * x)))


# ---------------- Pallas kernels ----------------
def _layernorm_kernel(x_ref, g_ref, b_ref, o_ref):
    o_ref[...] = _ln(x_ref[...], g_ref[...], b_ref[...])


def _fused_step_kernel(x_ref,
                       pw1_ref, pb1_ref, pg_ref, pbe_ref, pw2_ref, pb2_ref,
                       vw1_ref, vb1_ref, vg_ref, vbe_ref, vw2_ref, vb2_ref,
                       tw1a_ref, tproj_ref, tg_ref, tbe_ref, tw2_ref, tb2_ref,
                       probs_ref, value_ref, next_ref):
    """Per grid step (= one batch element): policy + value + all-action transitions."""
    x = x_ref[0]                                                    # (1, H)

    # --- policy head: Linear -> LN -> GELU -> (Dropout=id) -> Linear -> softmax(l/T) ---
    hp = jnp.dot(x, pw1_ref[...], preferred_element_type=jnp.float32) + pb1_ref[...]
    hp = _gelu(_ln(hp, pg_ref[...], pbe_ref[...]))
    logits = jnp.dot(hp, pw2_ref[...], preferred_element_type=jnp.float32) + pb2_ref[...]
    z = logits * (1.0 / POLICY_TEMP)
    z = z - jnp.max(z, axis=-1, keepdims=True)
    e = jnp.exp(z)
    probs_ref[0] = e * pl.reciprocal(jnp.sum(e, axis=-1, keepdims=True), approx=True)

    # --- value head: Linear -> LN -> GELU -> (Dropout=id) -> <h, w2> + b -> tanh * scale ---
    hv = jnp.dot(x, vw1_ref[...], preferred_element_type=jnp.float32) + vb1_ref[...]
    hv = _gelu(_ln(hv, vg_ref[...], vbe_ref[...]))
    # H->1 projection as a VPU multiply + reduce instead of a 1-wide MXU matmul.
    val = jnp.sum(hv * vw2_ref[...], axis=-1, keepdims=True) + vb2_ref[...]   # (1, 1)
    value_ref[0] = jnp.tanh(val) * VALUE_SCALE

    # --- state transition for ALL actions ---
    # concat([state, emb]) @ W1 + b1 == state @ W1a + (emb @ W1b + b1); the second
    # term is the precomputed (A, H) table tproj_ref.
    sproj = jnp.dot(x, tw1a_ref[...], preferred_element_type=jnp.float32)     # (1, H)
    ht = sproj + tproj_ref[...]                                               # (A, H)
    ht = _gelu(_ln(ht, tg_ref[...], tbe_ref[...]))
    nxt = jnp.dot(ht, tw2_ref[...], preferred_element_type=jnp.float32) + tb2_ref[...]
    next_ref[0] = nxt + x                                                     # residual


def _proj_residual_kernel(s_ref, w_ref, b_ref, h_ref, o_ref):
    # output_projection(search)[:, None, :] broadcast over seq + hidden_states
    proj = jnp.dot(s_ref[...], w_ref[...], preferred_element_type=jnp.float32) + b_ref[...]
    o_ref[...] = h_ref[...] + proj[:, None, :]


# ---------------- pallas_call wrappers ----------------
def _bcast_spec(shape):
    zero = (0,) * len(shape)
    return pl.BlockSpec(shape, lambda i, _z=zero: _z)


@jax.jit
def layer_norm_forward(x, g, b):
    """LayerNorm over the whole (B*S, H) slab as a single tile."""
    B, S, H = x.shape
    x2 = x.reshape(B * S, H)
    out = pl.pallas_call(
        _layernorm_kernel,
        out_shape=jax.ShapeDtypeStruct((B * S, H), jnp.float32),
        grid=(1,),
        in_specs=[pl.BlockSpec((B * S, H), lambda i: (0, 0)),
                  pl.BlockSpec((1, H), lambda i: (0, 0)),
                  pl.BlockSpec((1, H), lambda i: (0, 0))],
        out_specs=pl.BlockSpec((B * S, H), lambda i: (0, 0)),
    )(x2, g, b)
    return out.reshape(B, S, H)


@jax.jit
def proj_residual_forward(search, hidden, w, b):
    B, S, H = hidden.shape
    return pl.pallas_call(
        _proj_residual_kernel,
        out_shape=jax.ShapeDtypeStruct((B, S, H), jnp.float32),
        grid=(1,),
        in_specs=[pl.BlockSpec((B, H), lambda i: (0, 0)),
                  pl.BlockSpec((H, H), lambda i: (0, 0)),
                  pl.BlockSpec((1, H), lambda i: (0, 0)),
                  pl.BlockSpec((B, S, H), lambda i: (0, 0, 0))],
        out_specs=pl.BlockSpec((B, S, H), lambda i: (0, 0, 0)),
    )(search, w, b, hidden)


def _make_fused_step(params):
    """Build the jitted fused (policy + value + all-action transition) step."""
    p, v, t = params["policy"], params["value"], params["transition"]
    # Precompute action-embedding projection once (feedback #3): (A, H) table.
    act_proj = (jnp.dot(params["action_embeddings"], t["w1b"]) + t["b1"]).astype(jnp.float32)

    weights = (p["w1"], p["b1"], p["g"], p["be"], p["w2"], p["b2"],
               v["w1"], v["b1"], v["g"], v["be"], v["w2_row"], v["b2"],
               t["w1a"], act_proj, t["g"], t["be"], t["w2"], t["b2"])
    weight_specs = [_bcast_spec(w.shape) for w in weights]

    @jax.jit
    def fused_step(leaf_states):                      # (B, H) float32
        B = leaf_states.shape[0]
        x3 = leaf_states.reshape(B, 1, HIDDEN)
        probs, values, next_states = pl.pallas_call(
            _fused_step_kernel,
            out_shape=(
                jax.ShapeDtypeStruct((B, 1, ACTION_SPACE), jnp.float32),
                jax.ShapeDtypeStruct((B, 1, 1), jnp.float32),
                jax.ShapeDtypeStruct((B, ACTION_SPACE, HIDDEN), jnp.float32),
            ),
            grid=(B,),
            in_specs=[pl.BlockSpec((1, 1, HIDDEN), lambda i: (i, 0, 0))] + weight_specs,
            out_specs=[
                pl.BlockSpec((1, 1, ACTION_SPACE), lambda i: (i, 0, 0)),
                pl.BlockSpec((1, 1, 1), lambda i: (i, 0, 0)),
                pl.BlockSpec((1, ACTION_SPACE, HIDDEN), lambda i: (i, 0, 0)),
            ],
            compiler_params=pltpu.CompilerParams(
                dimension_semantics=("parallel",)),
        )(x3, *weights)
        return probs[:, 0, :], values[:, 0, 0], next_states

    return fused_step


# ---------------- host-side MCTS (control flow, no clean Pallas equivalent) ----------------
class TreeNode:
    def __init__(self, state, parent=None, action=None, prior=0.0, visit_count=0):
        self.state = state
        self.parent = parent
        self.action = action
        self.prior = prior
        self.children = {}
        self.visit_count = visit_count
        self.value_sum = 0.0
        self.depth = 0 if parent is None else parent.depth + 1

    def expanded(self):
        return len(self.children) > 0

    def value(self):
        if self.visit_count == 0:
            return 0.0
        return self.value_sum / self.visit_count

    def select_child(self, exploration_constant):
        # guard is a no-op when visit_count >= 1 (always true for expanded nodes)
        log_visit = math.log(max(self.visit_count, 1))
        scores = {a: c.value() + exploration_constant * c.prior * math.sqrt(log_visit)
                  / (1 + c.visit_count) for a, c in self.children.items()}
        best_action = max(scores, key=scores.get)
        return self.children[best_action]

    def expand(self, actions, action_priors, states):
        for action, prior in action_priors.items():
            if action not in self.children:
                self.children[action] = TreeNode(state=states[action], parent=self,
                                                 action=action, prior=prior)

    def backpropagate(self, value, discount_factor=1.0):
        node = self
        while node is not None:
            node.visit_count += 1
            node.value_sum += value
            value *= discount_factor
            node = node.parent


def batched_mcts_search(root_states, fused_step, num_simulations=NUM_SIMULATIONS):
    """Run B independent MCTS trees in lockstep: ONE fused device call per simulation."""
    B = root_states.shape[0]
    roots = [TreeNode(state=np.asarray(root_states[b])) for b in range(B)]
    stats = [{"max_depth": 0, "total_visits": 0, "leaf_values": []} for _ in range(B)]
    top_k = min(TOP_K, ACTION_SPACE)

    for _ in range(num_simulations):
        # --- selection (host, per tree) ---
        leaves, paths = [], []
        for b in range(B):
            leaf = roots[b]
            path = [leaf]
            while leaf.expanded() and leaf.depth < MAX_TREE_DEPTH:
                leaf = leaf.select_child(EXPLORATION_C)
                path.append(leaf)
            leaves.append(leaf)
            paths.append(path)
            stats[b]["max_depth"] = max(stats[b]["max_depth"], leaf.depth)

        # --- one fused device step: policy + value + all-action transitions (batched over B) ---
        leaf_batch = jnp.asarray(np.stack([lf.state for lf in leaves]).astype(np.float32))
        probs_d, values_d, next_d = fused_step(leaf_batch)
        probs = np.asarray(probs_d)          # (B, A)
        values = np.asarray(values_d)        # (B,)
        next_states = np.asarray(next_d)     # (B, A, H)

        # --- expansion + backpropagation (host, per tree) ---
        for b in range(B):
            leaf = leaves[b]
            if leaf.depth < MAX_TREE_DEPTH:
                action_probs = probs[b]
                actions = np.argsort(action_probs)[-top_k:]
                selected = action_probs[actions]
                selected = selected / np.sum(selected)
                action_priors = {int(a): float(pr) for a, pr in zip(actions, selected)}
                states = {int(a): next_states[b, int(a)] for a in actions}
                leaf.expand(actions, action_priors, states)
            value = float(values[b])
            stats[b]["leaf_values"].append(value)
            # NOTE: matches the PyTorch reference exactly — backpropagate() is called
            # for EVERY node on the search path (each call walks up to the root).
            for node in reversed(paths[b]):
                stats[b]["total_visits"] += 1
                node.backpropagate(value, DISCOUNT)
    return roots, stats


def sample_action_from_tree(root, temperature=TEMPERATURE):
    visit_counts = np.array([c.visit_count for c in root.children.values()], dtype=np.float64)
    actions = np.array(list(root.children.keys()))
    if temperature == 0:
        return int(actions[np.argmax(visit_counts)])
    visit_counts = visit_counts ** (1.0 / temperature)
    probs = visit_counts / np.sum(visit_counts)
    idx = np.random.choice(len(actions), p=probs)
    return int(actions[idx])


# ---------------- module forward ----------------
def forward(hidden_states, params, reasoning_type="mcts"):
    outputs = {"hidden_states": hidden_states}
    if reasoning_type not in ("mcts", "beam"):
        return outputs
    B, S, H = hidden_states.shape
    normalized = layer_norm_forward(hidden_states, params["ln_g"], params["ln_b"])

    if reasoning_type == "mcts":
        fused_step = _make_fused_step(params)
        roots_np = np.asarray(normalized[:, 0, :])        # single D2H for all roots (B, H)
        roots, stats_list = batched_mcts_search(roots_np, fused_step)

        search_results = []
        for b in range(B):
            root = roots[b]
            sampled = [root.state]
            node = root
            for _ in range(SAMPLING_STEPS):
                if not node.expanded() or len(node.children) == 0:
                    break
                action = sample_action_from_tree(node)
                if action in node.children:
                    node = node.children[action]
                    sampled.append(node.state)
            if len(sampled) > 1:
                final_state = sampled[-1]
            elif node.expanded() and len(node.children) > 0:
                best_action = max(node.children.items(), key=lambda kv: kv[1].visit_count)[0]
                final_state = node.children[best_action].state
            else:
                final_state = node.state
            search_results.append(np.asarray(final_state))
        search_tensor = jnp.asarray(np.stack(search_results).astype(np.float32))  # (B, H)
        outputs["search_stats"] = stats_list
    else:
        # TODO(synk): beam-search reasoning path not implemented (host-side heap + same kernels).
        raise NotImplementedError("beam reasoning not implemented")

    # output_projection(search)[:, None, :] broadcast over seq + residual, fused in one kernel
    outputs["hidden_states"] = proj_residual_forward(search_tensor, hidden_states,
                                                     params["out_w"], params["out_b"])
    return outputs


# ---------------- deterministic parameter init ----------------
def init_params(key):
    H, A = HIDDEN, ACTION_SPACE
    keys = jax.random.split(key, 9)

    def lin(k, din, dout, scale=0.02):
        return jax.random.normal(k, (din, dout), jnp.float32) * scale

    ones = lambda: jnp.ones((1, H), jnp.float32)
    zeros = lambda: jnp.zeros((1, H), jnp.float32)

    return {
        "ln_g": jnp.ones((1, H), jnp.float32),
        "ln_b": jnp.zeros((1, H), jnp.float32),
        "policy": {
            "w1": lin(keys[0], H, H), "b1": zeros(), "g": ones(), "be": zeros(),
            "w2": lin(keys[1], H, A), "b2": jnp.zeros((1, A), jnp.float32),
        },
        "value": {
            "w1": lin(keys[2], H, H), "b1": zeros(), "g": ones(), "be": zeros(),
            # H->1 head stored as a (1, H) row vector (used as a VPU reduce in-kernel)
            "w2_row": lin(keys[3], 1, H), "b2": jnp.zeros((1, 1), jnp.float32),
        },
        "transition": {
            "w1a": lin(keys[4], H, H), "w1b": lin(keys[5], H, H),
            "b1": zeros(), "g": ones(), "be": zeros(),
            "w2": lin(keys[6], H, H), "b2": zeros(),
        },
        "out_w": lin(keys[7], H, H),
        "out_b": zeros(),
        "action_embeddings": jax.random.normal(keys[8], (A, H), jnp.float32),
    }


if __name__ == "__main__":
    np.random.seed(0)  # deterministic visit-count sampling (np.random.choice)
    key = jax.random.PRNGKey(0)
    pkey, xkey = jax.random.split(key)
    params = init_params(pkey)

    B, S, H = 2, 8, HIDDEN
    hidden_states = jax.random.normal(xkey, (B, S, H), jnp.float32)

    out = forward(hidden_states, params, reasoning_type="mcts")
    jax.block_until_ready(out["hidden_states"])
    assert out["hidden_states"].shape == (B, S, H)
    print("KERNEL_OK")
</pallas_src>

<mosaic_0001>
module attributes {stable_mosaic.version = 11 : i64} {
  func.func @_layernorm_kernel(%arg0: i32, %arg1: memref<16x32xf32, #tpu.memory_space<vmem>>, %arg2: memref<1x32xf32, #tpu.memory_space<vmem>>, %arg3: memref<1x32xf32, #tpu.memory_space<vmem>>, %arg4: memref<16x32xf32, #tpu.memory_space<vmem>>) attributes {dimension_semantics = [#tpu.dimension_semantics<arbitrary>], iteration_bounds = array<i64: 1>, scalar_prefetch = 0 : i64, scratch_operands = 0 : i64, tpu.core_type = #tpu.core_type<tc>, window_params = [{pipeline_mode = #tpu.pipeline_mode<synchronous>, transform_indices = @transform_0, window_bounds = array<i64: 16, 32>}, {pipeline_mode = #tpu.pipeline_mode<synchronous>, transform_indices = @transform_1, window_bounds = array<i64: 1, 32>}, {pipeline_mode = #tpu.pipeline_mode<synchronous>, transform_indices = @transform_2, window_bounds = array<i64: 1, 32>}, {pipeline_mode = #tpu.pipeline_mode<synchronous>, transform_indices = @transform_3, window_bounds = array<i64: 16, 32>}]} {
    %c0 = arith.constant 0 : index
    %c0_0 = arith.constant 0 : index
    %0 = vector.load %arg1[%c0, %c0_0] : memref<16x32xf32, #tpu.memory_space<vmem>>, vector<16x32xf32>
    %c0_1 = arith.constant 0 : index
    %c0_2 = arith.constant 0 : index
    %1 = vector.load %arg2[%c0_1, %c0_2] : memref<1x32xf32, #tpu.memory_space<vmem>>, vector<1x32xf32>
    %c0_3 = arith.constant 0 : index
    %c0_4 = arith.constant 0 : index
    %2 = vector.load %arg3[%c0_3, %c0_4] : memref<1x32xf32, #tpu.memory_space<vmem>>, vector<1x32xf32>
    %cst = arith.constant dense<0.000000e+00> : vector<16xf32>
    %3 = vector.multi_reduction <add>, %0, %cst [1] : vector<16x32xf32> to vector<16xf32>
    %4 = vector.shape_cast %3 : vector<16xf32> to vector<16x1xf32>
    %cst_5 = arith.constant 3.200000e+01 : f32
    %5 = vector.broadcast %cst_5 : f32 to vector<16x1xf32>
    %6 = arith.divf %4, %5 : vector<16x1xf32>
    %7 = vector.broadcast %6 : vector<16x1xf32> to vector<16x32xf32>
    %8 = arith.subf %0, %7 : vector<16x32xf32>
    %9 = arith.mulf %8, %8 : vector<16x32xf32>
    %cst_6 = arith.constant dense<0.000000e+00> : vector<16xf32>
    %10 = vector.multi_reduction <add>, %9, %cst_6 [1] : vector<16x32xf32> to vector<16xf32>
    %11 = vector.shape_cast %10 : vector<16xf32> to vector<16x1xf32>
    %cst_7 = arith.constant 3.200000e+01 : f32
    %12 = vector.broadcast %cst_7 : f32 to vector<16x1xf32>
    %13 = arith.divf %11, %12 : vector<16x1xf32>
    %14 = vector.broadcast %6 : vector<16x1xf32> to vector<16x32xf32>
    %15 = arith.subf %0, %14 : vector<16x32xf32>
    %cst_8 = arith.constant 9.99999974E-6 : f32
    %16 = vector.broadcast %cst_8 : f32 to vector<16x1xf32>
    %17 = arith.addf %13, %16 : vector<16x1xf32>
    %18 = math.rsqrt %17 : vector<16x1xf32>
    %19 = vector.broadcast %18 : vector<16x1xf32> to vector<16x32xf32>
    %20 = arith.mulf %15, %19 : vector<16x32xf32>
    %21 = vector.broadcast %1 : vector<1x32xf32> to vector<16x32xf32>
    %22 = arith.mulf %20, %21 : vector<16x32xf32>
    %23 = vector.broadcast %2 : vector<1x32xf32> to vector<16x32xf32>
    %24 = arith.addf %22, %23 : vector<16x32xf32>
    %c0_9 = arith.constant 0 : index
    %c0_10 = arith.constant 0 : index
    %25 = vector.load %arg4[%c0_9, %c0_10] : memref<16x32xf32, #tpu.memory_space<vmem>>, vector<16x32xf32>
    tpu.vector_store %arg4[%c0_9, %c0_10], %24 {strides = array<i32>} : memref<16x32xf32, #tpu.memory_space<vmem>>, vector<16x32xf32>,
    return
  }
  func.func @transform_0(%arg0: i32) -> (i32, i32) {
    %c0_i32 = arith.constant 0 : i32
    %c0_i32_0 = arith.constant 0 : i32
    %c0_i32_1 = arith.constant 0 : i32
    return %c0_i32, %c0_i32_0 : i32, i32
  }
  func.func @transform_1(%arg0: i32) -> (i32, i32) {
    %c0_i32 = arith.constant 0 : i32
    %c0_i32_0 = arith.constant 0 : i32
    %c0_i32_1 = arith.constant 0 : i32
    return %c0_i32, %c0_i32_0 : i32, i32
  }
  func.func @transform_2(%arg0: i32) -> (i32, i32) {
    %c0_i32 = arith.constant 0 : i32
    %c0_i32_0 = arith.constant 0 : i32
    %c0_i32_1 = arith.constant 0 : i32
    return %c0_i32, %c0_i32_0 : i32, i32
  }
  func.func @transform_3(%arg0: i32) -> (i32, i32) {
    %c0_i32 = arith.constant 0 : i32
    %c0_i32_0 = arith.constant 0 : i32
    %c0_i32_1 = arith.constant 0 : i32
    return %c0_i32, %c0_i32_0 : i32, i32
  }
}

</mosaic_0001>

<bundles_post_ra>
// kernel: layer_norm_forward.1
= control target key start
LH: loop header
LB: loop body
LE: loop exit
PB: predicated region body
PF: predicated region fallthrough
CT: control target
= control target key end

     0   :  { %8 = vsyncpa [#allocation3], 0  ;;  %s220_s0 = inlined_call_operand.hbm [shape: f32[16,32], index: 0, kind: input, shape index: {}]   ;;  %s221_s1 = inlined_call_operand.vmem [shape: f32[1,32], index: 1, kind: input, shape index: {}]   ;;  %s222_s2 = inlined_call_operand.vmem [shape: f32[1,32], index: 2, kind: input, shape index: {}]   ;;  %s223_s3 = inlined_call_operand.hbm [shape: f32[16,32], index: 3, kind: output, shape index: {}]  }
   0x1   :  { %9 = vsyncpa [#allocation4], 0  ;;  %s154_s12 = smov [#allocation2]   ;;  %s106_s16 = scalar_lea.hbm %s220_s0, 256 }
   0x2   :  { %s15_s13 = sshll.u32 %s154_s12, 4  ;;  %p107_p0 = scmp.ne.s32.totalorder %s220_s0, %s106_s16  ;;  %s16_s13 = int_to_ptr.vmem [resolvable:$true] %s15_s13 }
   0x3   :  { %p110_p1 = scmp.lt.u32.totalorder %s106_s16, %s220_s0 }
   0x5   :  { %p112_p2 = pnand %p110_p1, %p107_p0 }
   0x7   :  { %115 = shalt.err (!%p112_p2)
}
   0x8   :  { %s116_s21 = scalar_lea.vmem %s16_s13, 256  ;;  %p121_p4 = scmp.lt.s32.totalorder %s16_s13, %s16_s13 }
   0x9   :  { %p117_p3 = scmp.ne.s32.totalorder %s16_s13, %s116_s21  ;;  %p122_p5 = scmp.lt.s32.totalorder %s116_s21, %s116_s21 }
   0xb   :  { %p123_p6 = por %p122_p5, %p121_p4 }
   0xd   :  { %p124_p7 = pnand %p123_p6, %p117_p3 }
   0xf   :  { %127 = shalt.err (!%p124_p7)
}
  0x10   :  { %s155_s22 = smov 128   ;;  %s156_s23 = smov 8  }
  0x11   :  { %21 = dma.hbm_to_vmem [thread:$0]  %s220_s0, 256, %s16_s13, [#allocation3], %s155_s22, %s155_s22, %s156_s23  }
  0x12   :  { %150 = dma.done.wait [#allocation3], 256  }
  0x13   :  { %151 = vsyncadd [#allocation3], 4294967040  ;;  %vm33_vm0 = vcmask 261120   ;;  %v29_v0 = vld [vmem:[#allocation2] sm:$0xff]  ;;  %v30_v1 = vld [vmem:[#allocation2 + $0x8] sm:$0xff]  ;;  %s157_s29 = smov [#allocation5]  }
  0x14   :  { %v34_v2 = vsel %vm33_vm0, %v29_v0, 0.0  ;;  %v37_v3 = vsel %vm33_vm0, %v30_v1, 0.0  ;;  %v96_v21 = vld [vmem:[%s221_s1] ss:$0 sm:$0xff]  ;;  %s84_s30 = sshll.u32 %s157_s29, 4  ;;  %s85_s30 = int_to_ptr.vmem [resolvable:$true] %s84_s30 }
  0x15   :  { %35 = vadd.xlane.f32.xlu0 %v34_v2  ;;  %v97_v23 = vld [vmem:[%s222_s2] ss:$0 sm:$0xff]  ;;  %s128_s4 = scalar_lea.vmem %s85_s30, 256  ;;  %p133_p9 = scmp.lt.s32.totalorder %s85_s30, %s85_s30 }
  0x16   :  { %p129_p8 = scmp.ne.s32.totalorder %s85_s30, %s128_s4  ;;  %p134_p10 = scmp.lt.s32.totalorder %s128_s4, %s128_s4 }
  0x18   :  { %p135_p11 = por %p134_p10, %p133_p9 }
  0x19   :  { %38 = vadd.xlane.f32.xlu0 %v37_v3 }
  0x1a   :  { %p136_p12 = pnand %p135_p11, %p129_p8 }
  0xa2   :  { %v36_v4 = vpop.xlane.xlu0 %35 }
  0xa3   :  { %v41_v5 = vmul.f32 0.03125, %v36_v4 }
  0xa5   :  { %v43_v6 = vsub.f32 %v29_v0, %v41_v5 }
  0xa6   :  { %v39_v7 = vpop.xlane.xlu0 %38 }
  0xa7   :  { %v42_v8 = vmul.f32 0.03125, %v39_v7  ;;  %v45_v9 = vmul.f32 %v43_v6, %v43_v6 }
  0xa9   :  { %v44_v10 = vsub.f32 %v30_v1, %v42_v8  ;;  %v47_v11 = vsel %vm33_vm0, %v45_v9, 0.0 }
  0xaa   :  { %48 = vadd.xlane.f32.xlu1 %v47_v11 }
  0xab   :  { %v46_v12 = vmul.f32 %v44_v10, %v44_v10 }
  0xad   :  { %v50_v13 = vsel %vm33_vm0, %v46_v12, 0.0 }
  0xae   :  { %51 = vadd.xlane.f32.xlu1 %v50_v13 }
 0x137   :  { %v49_v14 = vpop.xlane.xlu1 %48 }
 0x138   :  { %v53_v15 = vmul.f32 0.03125, %v49_v14 }
 0x13a   :  { %v55_v16 = vadd.f32 1e-05, %v53_v15 }
 0x13b   :  { %v52_v17 = vpop.xlane.xlu1 %51 }
 0x13c   :  { %102 = vrsqrt.f32 %v55_v16  ;;  %v54_v18 = vmul.f32 0.03125, %v52_v17 }
 0x13e   :  { %v56_v19 = vadd.f32 1e-05, %v54_v18 }
 0x140   :  { %104 = vrsqrt.f32 %v56_v19 }
 0x146   :  { %v103_v20 = vpop.eup %102 }
 0x147   :  { %v59_v22 = vmul.f32 %v103_v20, %v43_v6 }
 0x149   :  { %v67_v24 = vmul.f32 %v96_v21, %v59_v22 }
 0x14a   :  { %v105_v25 = vpop.eup %104 }
 0x14b   :  { %v60_v26 = vmul.f32 %v105_v25, %v44_v10  ;;  %v75_v27 = vadd.f32 %v97_v23, %v67_v24 }
 0x14d   :  { %v68_v28 = vmul.f32 %v96_v21, %v60_v26  ;;  %77 = vst.msk [vmem:[#allocation5] sm:$0xff] %vm33_vm0, %v75_v27 }
 0x14f   :  { %v76_v29 = vadd.f32 %v97_v23, %v68_v28 }
 0x151   :  { %78 = vst.msk [vmem:[#allocation5 + $0x8] sm:$0xff] %vm33_vm0, %v76_v29 }
 0x152   :  { %139 = shalt.err (!%p136_p12)
}
 0x153   :  { %s140_s5 = scalar_lea.hbm %s223_s3, 256 }
 0x154   :  { %p141_p13 = scmp.ne.s32.totalorder %s223_s3, %s140_s5  ;;  %p144_p0 = scmp.lt.u32.totalorder %s140_s5, %s223_s3 }
 0x156   :  { %p146_p1 = pnand %p144_p0, %p141_p13 }
 0x158   :  { %149 = shalt.err (!%p146_p1)
}
 0x159   :  { %90 = dma.vmem_to_hbm [thread:$0]  %s85_s30, 256, %s223_s3, [#allocation4], %s155_s22, %s155_s22, %s156_s23  }
 0x15a   :  { %152 = dma.done.wait [#allocation4], 256  }
 0x15b   :  { %153 = vsyncadd [#allocation4], 4294967040 }
 0x15c   :  { %94 = vsyncpa [#allocation3], 1 }
 0x15d   :  { %95 = vsyncpa [#allocation4], 1 }

</bundles_post_ra>
